<compile_context>
chip_gen: v7x
topology: tpu7x:2x2x1
jax: 0.10.0
libtpu: 0.0.40
codegen_flags: <defaults>
</compile_context>

<pallas_src>
import jax
import jax.numpy as jnp
from jax.experimental import pallas as pl
from jax.experimental.pallas import tpu as pltpu


def _round_up(x, m):
    return -(-x // m) * m


def decoder_kernel(emb_ref, hid_ref, enc_ref, att_w_ref, gru_w_ref,
                   fc1t_ref, fc2t_ref, bias_ref, out_ref):
    L = hid_ref.shape[0]
    Bp, S, He = enc_ref.shape
    E = emb_ref.shape[1]
    H = att_w_ref.shape[1]
    O = fc2t_ref.shape[1]

    emb = emb_ref[...]                         # (Bp, E)
    enc = enc_ref[...]                         # (Bp, S, He)
    h_prev = hid_ref[L - 1]                    # (Bp, H)  last GRU-layer hidden
    hid_sum = h_prev if L == 1 else jnp.sum(hid_ref[...], axis=0)

    # ---- packed biases / V row-vector: one (8, Wb) slab, static slices ----
    w1_b = bias_ref[0:1, 0:H]                  # (1, H)
    w2_b = bias_ref[1:2, 0:H]                  # (1, H)
    v_b = bias_ref[2:3, 0:1]                   # (1, 1)
    v_w = bias_ref[3:4, 0:H]                   # (1, H)
    b_ih = bias_ref[4:5, 0:3 * H]              # (1, 3H)
    b_hh = bias_ref[5:6, 0:3 * H]              # (1, 3H)
    fc1_b = bias_ref[6:7, 0:E]                 # (1, E)
    fc2_b = bias_ref[7:8, 0:O]                 # (1, O)

    # ---------------- Bahdanau attention ----------------
    w1t = att_w_ref[0:He]                      # (He, H)
    w2t = att_w_ref[He:He + H]                 # (H, H)
    # W1(enc_output) as a single 2-D MXU dot: (Bp*S, He) @ (He, H)
    w1_out = jnp.dot(enc.reshape(Bp * S, He), w1t,
                     preferred_element_type=jnp.float32).reshape(Bp, S, H)
    w2_out = jnp.dot(hid_sum, w2t, preferred_element_type=jnp.float32) + w2_b
    score = jnp.tanh(w1_out + w1_b.reshape(1, 1, H) + w2_out[:, None, :])
    # V(score): elementwise mul + lane reduce (avoids a degenerate N=1 matmul)
    v_logit = jnp.sum(score * v_w.reshape(1, 1, H), axis=-1) + v_b   # (Bp, S)
    m = jnp.max(v_logit, axis=-1, keepdims=True)
    e = jnp.exp(v_logit - m)
    aw = e / jnp.sum(e, axis=-1, keepdims=True)                      # (Bp, S)
    context = jnp.sum(aw[:, :, None] * enc, axis=1)                  # (Bp, He)

    # ---------------- GRU cell (1 layer, seq_len = 1), torch gate order r,z,n ----
    # concat([context, emb]) @ w_ih^T split into two dots (no lane repack).
    w_ctx = gru_w_ref[0:He]                    # (He, 3H)
    w_emb = gru_w_ref[He:He + E]               # (E, 3H)
    w_hh = gru_w_ref[He + E:He + E + H]        # (H, 3H)
    gi = (jnp.dot(context, w_ctx, preferred_element_type=jnp.float32)
          + jnp.dot(emb, w_emb, preferred_element_type=jnp.float32) + b_ih)
    gh = jnp.dot(h_prev, w_hh, preferred_element_type=jnp.float32) + b_hh
    rz = jax.nn.sigmoid(gi[:, 0:2 * H] + gh[:, 0:2 * H])             # r | z
    r = rz[:, 0:H]
    z = rz[:, H:2 * H]
    n = jnp.tanh(gi[:, 2 * H:3 * H] + r * gh[:, 2 * H:3 * H])
    h_new = (1.0 - z) * n + z * h_prev                               # (Bp, H)

    # ---------------- FC head: Linear -> LeakyReLU(0.01) -> Linear ----------------
    f1 = jnp.dot(h_new, fc1t_ref[...], preferred_element_type=jnp.float32) + fc1_b
    f1 = jnp.where(f1 >= 0.0, f1, 0.01 * f1)
    logits = jnp.dot(f1, fc2t_ref[...], preferred_element_type=jnp.float32) + fc2_b

    # ---------------- single lane-dense output slab ----------------
    Wout = out_ref.shape[1]
    parts = [logits, h_new, aw]
    pad = Wout - (O + H + S)
    if pad > 0:
        parts.append(jnp.zeros((Bp, pad), jnp.float32))
    out_ref[...] = jnp.concatenate(parts, axis=-1)


def decoder_forward(params, x_ids, hidden, enc_output):
    """x_ids: (B,1) int32, hidden: (L,B,H) f32, enc_output: (B,S,He) f32."""
    B = x_ids.shape[0]
    L, _, H = hidden.shape
    S, He = enc_output.shape[1], enc_output.shape[2]
    E = params['emb'].shape[1]
    O = params['fc2_w'].shape[0]
    # TODO(synk): multi-layer GRU stacking not implemented (module default layers=1).
    assert L == 1, "kernel implements the 1-layer GRU configuration"

    # glue (plain JAX): embedding gather + pad batch to a multiple of 8 sublanes
    Bp = _round_up(max(B, 8), 8)
    emb_x = jnp.take(params['emb'], x_ids[:, 0], axis=0)             # (B, E)
    emb_p = jnp.pad(emb_x, ((0, Bp - B), (0, 0)))
    hid_p = jnp.pad(hidden, ((0, 0), (0, Bp - B), (0, 0)))
    enc_p = jnp.pad(enc_output, ((0, Bp - B), (0, 0), (0, 0)))

    # pack weights into fewer, larger VMEM slabs (fewer DMA descriptors)
    att_w = jnp.concatenate([params['w1_w'].T, params['w2_w'].T], axis=0)   # (He+H, H)
    gru_w = jnp.concatenate([params['w_ih'].T, params['w_hh'].T], axis=0)   # (He+E+H, 3H)
    fc1t = params['fc1_w'].T                                                 # (H, E)
    fc2t = params['fc2_w'].T                                                 # (E, O)

    # all biases + the V row-vector packed into one (8, Wb) slab
    Wb = _round_up(max(H, 3 * H, E, O), 128)
    rows = [params['w1_b'], params['w2_b'], params['v_b'], params['v_w'][0],
            params['b_ih'], params['b_hh'], params['fc1_b'], params['fc2_b']]
    bias_slab = jnp.zeros((8, Wb), jnp.float32)
    for i, r in enumerate(rows):
        bias_slab = bias_slab.at[i, :r.shape[0]].set(r.astype(jnp.float32))

    Wout = _round_up(O + H + S, 128)

    vmem = pl.BlockSpec(memory_space=pltpu.MemorySpace.VMEM)
    out = pl.pallas_call(
        decoder_kernel,
        out_shape=jax.ShapeDtypeStruct((Bp, Wout), jnp.float32),
        in_specs=[vmem] * 8,
        out_specs=vmem,
    )(emb_p, hid_p, enc_p, att_w, gru_w, fc1t, fc2t, bias_slab)

    # unpack + match PyTorch return shapes: logits (B,O), hidden (1,B,H), aw (B,S,1)
    logits = out[:B, 0:O]
    h_new = out[:B, O:O + H].reshape(1, B, H)
    aw = out[:B, O + H:O + H + S].reshape(B, S, 1)
    return logits, h_new, aw


def decoder_reference(params, x_ids, hidden, enc_output):
    """Pure-JAX reference mirroring the PyTorch forward (for sanity check)."""
    emb_x = jnp.take(params['emb'], x_ids[:, 0], axis=0)             # (B,E)
    hid_sum = jnp.sum(hidden, axis=0)                                # (B,H)
    score = jnp.tanh(enc_output @ params['w1_w'].T + params['w1_b']
                     + (hid_sum @ params['w2_w'].T + params['w2_b'])[:, None, :])
    v = score @ params['v_w'].T + params['v_b']                      # (B,S,1)
    aw = jax.nn.softmax(v, axis=1)
    context = jnp.sum(aw * enc_output, axis=1)                       # (B,He)
    attend = jnp.concatenate([context, emb_x], axis=-1)
    H = params['w2_w'].shape[0]
    gi = attend @ params['w_ih'].T + params['b_ih']
    gh = hidden[0] @ params['w_hh'].T + params['b_hh']
    r = jax.nn.sigmoid(gi[:, :H] + gh[:, :H])
    z = jax.nn.sigmoid(gi[:, H:2 * H] + gh[:, H:2 * H])
    n = jnp.tanh(gi[:, 2 * H:] + r * gh[:, 2 * H:])
    h_new = (1 - z) * n + z * hidden[0]
    f1 = h_new @ params['fc1_w'].T + params['fc1_b']
    f1 = jnp.where(f1 >= 0, f1, 0.01 * f1)
    logits = f1 @ params['fc2_w'].T + params['fc2_b']
    return logits, h_new[None], aw


if __name__ == "__main__":
    # small shapes consistent with the module
    B, S = 2, 8                       # batch, encoder max_length
    O, E, H = 32, 32, 32              # output_dim (vocab), embed_dim, hidden_dim
    He = H                            # enc_outstate_dim defaults to hidden_dim
    L = 1                             # GRU layers

    key = jax.random.PRNGKey(0)
    ks = jax.random.split(key, 16)
    f32 = jnp.float32
    params = {
        'emb':   0.1 * jax.random.normal(ks[0], (O, E), f32),
        'w1_w':  0.1 * jax.random.normal(ks[1], (H, He), f32),
        'w1_b':  0.1 * jax.random.normal(ks[2], (H,), f32),
        'w2_w':  0.1 * jax.random.normal(ks[3], (H, H), f32),
        'w2_b':  0.1 * jax.random.normal(ks[4], (H,), f32),
        'v_w':   0.1 * jax.random.normal(ks[5], (1, H), f32),
        'v_b':   0.1 * jax.random.normal(ks[6], (1,), f32),
        'w_ih':  0.1 * jax.random.normal(ks[7], (3 * H, E + He), f32),
        'w_hh':  0.1 * jax.random.normal(ks[8], (3 * H, H), f32),
        'b_ih':  0.1 * jax.random.normal(ks[9], (3 * H,), f32),
        'b_hh':  0.1 * jax.random.normal(ks[10], (3 * H,), f32),
        'fc1_w': 0.1 * jax.random.normal(ks[11], (E, H), f32),
        'fc1_b': 0.1 * jax.random.normal(ks[12], (E,), f32),
        'fc2_w': 0.1 * jax.random.normal(ks[13], (O, E), f32),
        'fc2_b': 0.1 * jax.random.normal(ks[14], (O,), f32),
    }

    x_ids = jax.random.randint(ks[15], (B, 1), 0, O, dtype=jnp.int32)
    hidden = 0.1 * jax.random.normal(jax.random.PRNGKey(1), (L, B, H), f32)
    enc_out = 0.1 * jax.random.normal(jax.random.PRNGKey(2), (B, S, He), f32)

    logits, h_new, aw = decoder_forward(params, x_ids, hidden, enc_out)
    jax.block_until_ready((logits, h_new, aw))

    # sanity-check against a pure-JAX reference of the PyTorch forward
    ref_logits, ref_h, ref_aw = decoder_reference(params, x_ids, hidden, enc_out)
    assert jnp.allclose(logits, ref_logits, atol=1e-5, rtol=1e-5)
    assert jnp.allclose(h_new, ref_h, atol=1e-5, rtol=1e-5)
    assert jnp.allclose(aw, ref_aw, atol=1e-5, rtol=1e-5)

    print("KERNEL_OK")
</pallas_src>

<mosaic_0001>
module attributes {stable_mosaic.version = 11 : i64} {
  func.func @decoder_kernel(%arg0: memref<8x32xf32, #tpu.memory_space<vmem>>, %arg1: memref<1x8x32xf32, #tpu.memory_space<vmem>>, %arg2: memref<8x8x32xf32, #tpu.memory_space<vmem>>, %arg3: memref<64x32xf32, #tpu.memory_space<vmem>>, %arg4: memref<96x96xf32, #tpu.memory_space<vmem>>, %arg5: memref<32x32xf32, #tpu.memory_space<vmem>>, %arg6: memref<32x32xf32, #tpu.memory_space<vmem>>, %arg7: memref<8x128xf32, #tpu.memory_space<vmem>>, %arg8: memref<8x128xf32, #tpu.memory_space<vmem>>) attributes {dimension_semantics = [], scalar_prefetch = 0 : i64, scratch_operands = 0 : i64, tpu.core_type = #tpu.core_type<tc>} {
    %c0 = arith.constant 0 : index
    %c0_0 = arith.constant 0 : index
    %0 = vector.load %arg0[%c0, %c0_0] : memref<8x32xf32, #tpu.memory_space<vmem>>, vector<8x32xf32>
    %c0_1 = arith.constant 0 : index
    %c0_2 = arith.constant 0 : index
    %c0_3 = arith.constant 0 : index
    %1 = vector.load %arg2[%c0_1, %c0_2, %c0_3] : memref<8x8x32xf32, #tpu.memory_space<vmem>>, vector<8x8x32xf32>
    %c0_4 = arith.constant 0 : index
    %c0_5 = arith.constant 0 : index
    %c0_6 = arith.constant 0 : index
    %2 = vector.load %arg1[%c0_4, %c0_5, %c0_6] : memref<1x8x32xf32, #tpu.memory_space<vmem>>, vector<1x8x32xf32>
    %3 = vector.shape_cast %2 : vector<1x8x32xf32> to vector<8x32xf32>
    %c0_7 = arith.constant 0 : index
    %c0_8 = arith.constant 0 : index
    %4 = vector.load %arg7[%c0_7, %c0_8] : memref<8x128xf32, #tpu.memory_space<vmem>>, vector<1x32xf32>
    %c1 = arith.constant 1 : index
    %c0_9 = arith.constant 0 : index
    %5 = vector.load %arg7[%c1, %c0_9] : memref<8x128xf32, #tpu.memory_space<vmem>>, vector<1x32xf32>
    %c2 = arith.constant 2 : index
    %c0_10 = arith.constant 0 : index
    %6 = vector.load %arg7[%c2, %c0_10] : memref<8x128xf32, #tpu.memory_space<vmem>>, vector<1x1xf32>
    %c3 = arith.constant 3 : index
    %c0_11 = arith.constant 0 : index
    %7 = vector.load %arg7[%c3, %c0_11] : memref<8x128xf32, #tpu.memory_space<vmem>>, vector<1x32xf32>
    %c4 = arith.constant 4 : index
    %c0_12 = arith.constant 0 : index
    %8 = vector.load %arg7[%c4, %c0_12] : memref<8x128xf32, #tpu.memory_space<vmem>>, vector<1x96xf32>
    %c5 = arith.constant 5 : index
    %c0_13 = arith.constant 0 : index
    %9 = vector.load %arg7[%c5, %c0_13] : memref<8x128xf32, #tpu.memory_space<vmem>>, vector<1x96xf32>
    %c6 = arith.constant 6 : index
    %c0_14 = arith.constant 0 : index
    %10 = vector.load %arg7[%c6, %c0_14] : memref<8x128xf32, #tpu.memory_space<vmem>>, vector<1x32xf32>
    %c7 = arith.constant 7 : index
    %c0_15 = arith.constant 0 : index
    %11 = vector.load %arg7[%c7, %c0_15] : memref<8x128xf32, #tpu.memory_space<vmem>>, vector<1x32xf32>
    %c0_16 = arith.constant 0 : index
    %c0_17 = arith.constant 0 : index
    %12 = vector.load %arg3[%c0_16, %c0_17] : memref<64x32xf32, #tpu.memory_space<vmem>>, vector<32x32xf32>
    %c32 = arith.constant 32 : index
    %c0_18 = arith.constant 0 : index
    %13 = vector.load %arg3[%c32, %c0_18] : memref<64x32xf32, #tpu.memory_space<vmem>>, vector<32x32xf32>
    %14 = vector.shape_cast %1 : vector<8x8x32xf32> to vector<64x32xf32>
    %cst = arith.constant dense<0.000000e+00> : vector<64x32xf32>
    %15 = tpu.matmul %14, %12, %cst {dimension_numbers = #tpu.dot_dimension_numbers<[1], [0], [0], [1], [0, 0, 1, 1], [], []>} : vector<64x32xf32>, vector<32x32xf32>, vector<64x32xf32> -> vector<64x32xf32>
    %16 = vector.shape_cast %15 : vector<64x32xf32> to vector<8x8x32xf32>
    %cst_19 = arith.constant dense<0.000000e+00> : vector<8x32xf32>
    %17 = tpu.matmul %3, %13, %cst_19 {dimension_numbers = #tpu.dot_dimension_numbers<[1], [0], [0], [1], [0, 0, 1, 1], [], []>} : vector<8x32xf32>, vector<32x32xf32>, vector<8x32xf32> -> vector<8x32xf32>
    %18 = vector.broadcast %5 : vector<1x32xf32> to vector<8x32xf32>
    %19 = arith.addf %17, %18 : vector<8x32xf32>
    %20 = vector.shape_cast %4 : vector<1x32xf32> to vector<1x1x32xf32>
    %21 = vector.broadcast %20 : vector<1x1x32xf32> to vector<8x8x32xf32>
    %22 = arith.addf %16, %21 : vector<8x8x32xf32>
    %23 = vector.shape_cast %19 : vector<8x32xf32> to vector<8x1x32xf32>
    %24 = vector.broadcast %23 : vector<8x1x32xf32> to vector<8x8x32xf32>
    %25 = arith.addf %22, %24 : vector<8x8x32xf32>
    %26 = math.tanh %25 : vector<8x8x32xf32>
    %27 = vector.shape_cast %7 : vector<1x32xf32> to vector<1x1x32xf32>
    %28 = vector.broadcast %27 : vector<1x1x32xf32> to vector<8x8x32xf32>
    %29 = arith.mulf %26, %28 : vector<8x8x32xf32>
    %cst_20 = arith.constant dense<0.000000e+00> : vector<8x8xf32>
    %30 = vector.multi_reduction <add>, %29, %cst_20 [2] : vector<8x8x32xf32> to vector<8x8xf32>
    %31 = vector.broadcast %6 : vector<1x1xf32> to vector<8x8xf32>
    %32 = arith.addf %30, %31 : vector<8x8xf32>
    %cst_21 = arith.constant dense<0xFF800000> : vector<8xf32>
    %33 = vector.multi_reduction <maximumf>, %32, %cst_21 [1] : vector<8x8xf32> to vector<8xf32>
    %34 = vector.shape_cast %33 : vector<8xf32> to vector<8x1xf32>
    %35 = vector.broadcast %34 : vector<8x1xf32> to vector<8x8xf32>
    %36 = arith.subf %32, %35 : vector<8x8xf32>
    %37 = math.exp %36 : vector<8x8xf32>
    %cst_22 = arith.constant dense<0.000000e+00> : vector<8xf32>
    %38 = vector.multi_reduction <add>, %37, %cst_22 [1] : vector<8x8xf32> to vector<8xf32>
    %39 = vector.shape_cast %38 : vector<8xf32> to vector<8x1xf32>
    %40 = vector.broadcast %39 : vector<8x1xf32> to vector<8x8xf32>
    %41 = arith.divf %37, %40 : vector<8x8xf32>
    %42 = vector.shape_cast %41 : vector<8x8xf32> to vector<8x8x1xf32>
    %43 = vector.broadcast %42 : vector<8x8x1xf32> to vector<8x8x32xf32>
    %44 = arith.mulf %43, %1 : vector<8x8x32xf32>
    %cst_23 = arith.constant dense<0.000000e+00> : vector<8x32xf32>
    %45 = vector.multi_reduction <add>, %44, %cst_23 [1] : vector<8x8x32xf32> to vector<8x32xf32>
    %c0_24 = arith.constant 0 : index
    %c0_25 = arith.constant 0 : index
    %46 = vector.load %arg4[%c0_24, %c0_25] : memref<96x96xf32, #tpu.memory_space<vmem>>, vector<32x96xf32>
    %c32_26 = arith.constant 32 : index
    %c0_27 = arith.constant 0 : index
    %47 = vector.load %arg4[%c32_26, %c0_27] : memref<96x96xf32, #tpu.memory_space<vmem>>, vector<32x96xf32>
    %c64 = arith.constant 64 : index
    %c0_28 = arith.constant 0 : index
    %48 = vector.load %arg4[%c64, %c0_28] : memref<96x96xf32, #tpu.memory_space<vmem>>, vector<32x96xf32>
    %cst_29 = arith.constant dense<0.000000e+00> : vector<8x96xf32>
    %49 = tpu.matmul %45, %46, %cst_29 {dimension_numbers = #tpu.dot_dimension_numbers<[1], [0], [0], [1], [0, 0, 1, 1], [], []>} : vector<8x32xf32>, vector<32x96xf32>, vector<8x96xf32> -> vector<8x96xf32>
    %cst_30 = arith.constant dense<0.000000e+00> : vector<8x96xf32>
    %50 = tpu.matmul %0, %47, %cst_30 {dimension_numbers = #tpu.dot_dimension_numbers<[1], [0], [0], [1], [0, 0, 1, 1], [], []>} : vector<8x32xf32>, vector<32x96xf32>, vector<8x96xf32> -> vector<8x96xf32>
    %51 = arith.addf %49, %50 : vector<8x96xf32>
    %52 = vector.broadcast %8 : vector<1x96xf32> to vector<8x96xf32>
    %53 = arith.addf %51, %52 : vector<8x96xf32>
    %cst_31 = arith.constant dense<0.000000e+00> : vector<8x96xf32>
    %54 = tpu.matmul %3, %48, %cst_31 {dimension_numbers = #tpu.dot_dimension_numbers<[1], [0], [0], [1], [0, 0, 1, 1], [], []>} : vector<8x32xf32>, vector<32x96xf32>, vector<8x96xf32> -> vector<8x96xf32>
    %55 = vector.broadcast %9 : vector<1x96xf32> to vector<8x96xf32>
    %56 = arith.addf %54, %55 : vector<8x96xf32>
    %57 = vector.extract_strided_slice %53 {offsets = [0, 0], sizes = [8, 64], strides = [1, 1]} : vector<8x96xf32> to vector<8x64xf32>
    %58 = vector.extract_strided_slice %56 {offsets = [0, 0], sizes = [8, 64], strides = [1, 1]} : vector<8x96xf32> to vector<8x64xf32>
    %59 = arith.addf %57, %58 : vector<8x64xf32>
    %60 = arith.negf %59 : vector<8x64xf32>
    %61 = math.exp %60 : vector<8x64xf32>
    %cst_32 = arith.constant 1.000000e+00 : f32
    %62 = vector.broadcast %cst_32 : f32 to vector<8x64xf32>
    %63 = arith.addf %62, %61 : vector<8x64xf32>
    %64 = arith.divf %62, %63 : vector<8x64xf32>
    %65 = vector.extract_strided_slice %64 {offsets = [0, 0], sizes = [8, 32], strides = [1, 1]} : vector<8x64xf32> to vector<8x32xf32>
    %66 = vector.extract_strided_slice %64 {offsets = [0, 32], sizes = [8, 32], strides = [1, 1]} : vector<8x64xf32> to vector<8x32xf32>
    %67 = vector.extract_strided_slice %53 {offsets = [0, 64], sizes = [8, 32], strides = [1, 1]} : vector<8x96xf32> to vector<8x32xf32>
    %68 = vector.extract_strided_slice %56 {offsets = [0, 64], sizes = [8, 32], strides = [1, 1]} : vector<8x96xf32> to vector<8x32xf32>
    %69 = arith.mulf %65, %68 : vector<8x32xf32>
    %70 = arith.addf %67, %69 : vector<8x32xf32>
    %71 = math.tanh %70 : vector<8x32xf32>
    %cst_33 = arith.constant 1.000000e+00 : f32
    %72 = vector.broadcast %cst_33 : f32 to vector<8x32xf32>
    %73 = arith.subf %72, %66 : vector<8x32xf32>
    %74 = arith.mulf %73, %71 : vector<8x32xf32>
    %75 = arith.mulf %66, %3 : vector<8x32xf32>
    %76 = arith.addf %74, %75 : vector<8x32xf32>
    %c0_34 = arith.constant 0 : index
    %c0_35 = arith.constant 0 : index
    %77 = vector.load %arg5[%c0_34, %c0_35] : memref<32x32xf32, #tpu.memory_space<vmem>>, vector<32x32xf32>
    %cst_36 = arith.constant dense<0.000000e+00> : vector<8x32xf32>
    %78 = tpu.matmul %76, %77, %cst_36 {dimension_numbers = #tpu.dot_dimension_numbers<[1], [0], [0], [1], [0, 0, 1, 1], [], []>} : vector<8x32xf32>, vector<32x32xf32>, vector<8x32xf32> -> vector<8x32xf32>
    %79 = vector.broadcast %10 : vector<1x32xf32> to vector<8x32xf32>
    %80 = arith.addf %78, %79 : vector<8x32xf32>
    %cst_37 = arith.constant 0.000000e+00 : f32
    %81 = vector.broadcast %cst_37 : f32 to vector<8x32xf32>
    %82 = arith.cmpf oge, %80, %81 : vector<8x32xf32>
    %cst_38 = arith.constant 0.00999999977 : f32
    %83 = vector.broadcast %cst_38 : f32 to vector<8x32xf32>
    %84 = arith.mulf %83, %80 : vector<8x32xf32>
    %85 = arith.select %82, %80, %84 : vector<8x32xi1>, vector<8x32xf32>
    %c0_39 = arith.constant 0 : index
    %c0_40 = arith.constant 0 : index
    %86 = vector.load %arg6[%c0_39, %c0_40] : memref<32x32xf32, #tpu.memory_space<vmem>>, vector<32x32xf32>
    %cst_41 = arith.constant dense<0.000000e+00> : vector<8x32xf32>
    %87 = tpu.matmul %85, %86, %cst_41 {dimension_numbers = #tpu.dot_dimension_numbers<[1], [0], [0], [1], [0, 0, 1, 1], [], []>} : vector<8x32xf32>, vector<32x32xf32>, vector<8x32xf32> -> vector<8x32xf32>
    %88 = vector.broadcast %11 : vector<1x32xf32> to vector<8x32xf32>
    %89 = arith.addf %87, %88 : vector<8x32xf32>
    %cst_42 = arith.constant 0.000000e+00 : f32
    %90 = vector.broadcast %cst_42 : f32 to vector<8x56xf32>
    %91 = tpu.concatenate %89, %76, %41, %90 in 1 : vector<8x32xf32>, vector<8x32xf32>, vector<8x8xf32>, vector<8x56xf32> -> vector<8x128xf32>
    %c0_43 = arith.constant 0 : index
    %c0_44 = arith.constant 0 : index
    %92 = vector.load %arg8[%c0_43, %c0_44] : memref<8x128xf32, #tpu.memory_space<vmem>>, vector<8x128xf32>
    tpu.vector_store %arg8[%c0_43, %c0_44], %91 {strides = array<i32>} : memref<8x128xf32, #tpu.memory_space<vmem>>, vector<8x128xf32>,
    return
  }
}

</mosaic_0001>

<bundles_post_ra>
// kernel: tpu_custom_call.1
= control target key start
LH: loop header
LB: loop body
LE: loop exit
PB: predicated region body
PF: predicated region fallthrough
CT: control target
= control target key end

     0   :  { %13 = vsyncpa [#allocation3], 0  ;;  %s2213_s0 = inlined_call_operand.vmem [shape: f32[8,32], index: 0, kind: input, shape index: {}]   ;;  %s2214_s1 = inlined_call_operand.hbm [shape: f32[1,8,32], index: 1, kind: input, shape index: {}]   ;;  %s2215_s2 = inlined_call_operand.hbm [shape: f32[8,8,32], index: 2, kind: input, shape index: {}]   ;;  %s2216_s3 = inlined_call_operand.vmem [shape: f32[64,32], index: 3, kind: input, shape index: {}]   ;;  %s2217_s4 = inlined_call_operand.vmem [shape: f32[96,96], index: 4, kind: input, shape index: {}]   ;;  %s2218_s5 = inlined_call_operand.hbm [shape: f32[32,32], index: 5, kind: input, shape index: {}]   ;;  %s2219_s6 = inlined_call_operand.hbm [shape: f32[32,32], index: 6, kind: input, shape index: {}]   ;;  %s2220_s7 = inlined_call_operand.vmem [shape: f32[8,128], index: 7, kind: input, shape index: {}]   ;;  %s2221_s8 = inlined_call_operand.hbm [shape: f32[8,128], index: 8, kind: output, shape index: {}]  }
   0x1   :  { %14 = vsyncpa [#allocation6], 0 }
   0x2   :  { %15 = vsyncpa [#allocation9], 0 }
   0x3   :  { %16 = vsyncpa [#allocation4], 0  ;;  %s1740_s27 = smov [#allocation5]   ;;  %s1622_s9 = scalar_lea.hbm %s2215_s2, 1024 }
   0x4   :  { %s34_s28 = sshll.u32 %s1740_s27, 4  ;;  %p1623_p0 = scmp.ne.s32.totalorder %s2215_s2, %s1622_s9  ;;  %s35_s28 = int_to_ptr.vmem [resolvable:$true] %s34_s28 }
   0x5   :  { %p1626_p1 = scmp.lt.u32.totalorder %s1622_s9, %s2215_s2 }
   0x7   :  { %p1628_p2 = pnand %p1626_p1, %p1623_p0 }
   0x9   :  { %1631 = shalt.err (!%p1628_p2)
}
   0xa   :  { %s1632_s14 = scalar_lea.vmem %s35_s28, 1024  ;;  %p1637_p4 = scmp.lt.s32.totalorder %s35_s28, %s35_s28 }
   0xb   :  { %p1633_p3 = scmp.ne.s32.totalorder %s35_s28, %s1632_s14  ;;  %p1638_p5 = scmp.lt.s32.totalorder %s1632_s14, %s1632_s14 }
   0xd   :  { %p1639_p6 = por %p1638_p5, %p1637_p4 }
   0xf   :  { %p1640_p7 = pnand %p1639_p6, %p1633_p3 }
  0x11   :  { %1643 = shalt.err (!%p1640_p7)
}
  0x12   :  { %s1741_s15 = smov 128   ;;  %s1742_s16 = smov 8  }
  0x13   :  { %40 = dma.hbm_to_vmem [thread:$0]  %s2215_s2, 1024, %s35_s28, [#allocation6], %s1741_s15, %s1741_s15, %s1742_s16  }
  0x14   :  { %s1743_s19 = smov [#allocation2]   ;;  %s1744_s21 = smov [#allocation7]  }
  0x15   :  { %s25_s20 = sshll.u32 %s1743_s19, 4  ;;  %s50_s22 = sshll.u32 %s1744_s21, 4  ;;  %s26_s20 = int_to_ptr.vmem [resolvable:$true] %s25_s20  ;;  %s51_s22 = int_to_ptr.vmem [resolvable:$true] %s50_s22 }
  0x16   :  { %s1644_s25 = scalar_lea.hbm %s2214_s1, 128 }
  0x17   :  { %p1645_p8 = scmp.ne.s32.totalorder %s2214_s1, %s1644_s25  ;;  %p1648_p9 = scmp.lt.u32.totalorder %s1644_s25, %s2214_s1 }
  0x19   :  { %p1650_p10 = pnand %p1648_p9, %p1645_p8 }
  0x1b   :  { %1653 = shalt.err (!%p1650_p10)
}
  0x1c   :  { %s1654_s2 = scalar_lea.vmem %s26_s20, 128  ;;  %p1659_p12 = scmp.lt.s32.totalorder %s26_s20, %s26_s20 }
  0x1d   :  { %p1655_p11 = scmp.ne.s32.totalorder %s26_s20, %s1654_s2  ;;  %p1660_p13 = scmp.lt.s32.totalorder %s1654_s2, %s1654_s2 }
  0x1f   :  { %p1661_p0 = por %p1660_p13, %p1659_p12 }
  0x21   :  { %p1662_p1 = pnand %p1661_p0, %p1655_p11 }
  0x23   :  { %1665 = shalt.err (!%p1662_p1)
}
  0x24   :  { %28 = dma.hbm_to_vmem [thread:$0]  %s2214_s1, 128, %s26_s20, [#allocation3]  }
  0x25   :  { %s1666_s12 = scalar_lea.hbm %s2218_s5, 512 }
  0x26   :  { %p1667_p2 = scmp.ne.s32.totalorder %s2218_s5, %s1666_s12  ;;  %p1670_p3 = scmp.lt.u32.totalorder %s1666_s12, %s2218_s5 }
  0x28   :  { %p1672_p4 = pnand %p1670_p3, %p1667_p2 }
  0x2a   :  { %1675 = shalt.err (!%p1672_p4)
}
  0x2b   :  { %s1676_s19 = scalar_lea.vmem %s51_s22, 512  ;;  %p1681_p6 = scmp.lt.s32.totalorder %s51_s22, %s51_s22 }
  0x2c   :  { %p1677_p5 = scmp.ne.s32.totalorder %s51_s22, %s1676_s19  ;;  %p1682_p7 = scmp.lt.s32.totalorder %s1676_s19, %s1676_s19 }
  0x2e   :  { %p1683_p8 = por %p1682_p7, %p1681_p6 }
  0x30   :  { %p1684_p9 = pnand %p1683_p8, %p1677_p5 }
  0x32   :  { %1687 = shalt.err (!%p1684_p9)
}
  0x33   :  { %56 = dma.hbm_to_vmem [thread:$0]  %s2218_s5, 512, %s51_s22, [#allocation6], %s1741_s15, %s1741_s15, %s1742_s16  }
  0x34   :  { %s1745_s21 = smov [#allocation8]   ;;  %s1688_s26 = scalar_lea.hbm %s2219_s6, 512 }
  0x35   :  { %s62_s23 = sshll.u32 %s1745_s21, 4  ;;  %p1689_p10 = scmp.ne.s32.totalorder %s2219_s6, %s1688_s26  ;;  %s63_s23 = int_to_ptr.vmem [resolvable:$true] %s62_s23 }
  0x36   :  { %p1692_p11 = scmp.lt.u32.totalorder %s1688_s26, %s2219_s6 }
  0x38   :  { %p1694_p12 = pnand %p1692_p11, %p1689_p10 }
  0x3a   :  { %1697 = shalt.err (!%p1694_p12)
}
  0x3b   :  { %s1698_s28 = scalar_lea.vmem %s63_s23, 512  ;;  %p1703_p0 = scmp.lt.s32.totalorder %s63_s23, %s63_s23 }
  0x3c   :  { %p1699_p13 = scmp.ne.s32.totalorder %s63_s23, %s1698_s28  ;;  %p1704_p1 = scmp.lt.s32.totalorder %s1698_s28, %s1698_s28 }
  0x3e   :  { %p1705_p2 = por %p1704_p1, %p1703_p0 }
  0x40   :  { %p1706_p3 = pnand %p1705_p2, %p1699_p13 }
  0x42   :  { %1709 = shalt.err (!%p1706_p3)
}
  0x43   :  { %68 = dma.hbm_to_vmem [thread:$0]  %s2219_s6, 512, %s63_s23, [#allocation9], %s1741_s15, %s1741_s15, %s1742_s16  }
  0x44   :  { %1732 = dma.done.wait [#allocation3], 128  }
  0x45   :  { %1733 = vsyncadd [#allocation3], 4294967168 }
  0x46   :  { %1734 = dma.done.wait [#allocation6], 1536  }
  0x47   :  { %1735 = vsyncadd [#allocation6], 4294965760 }
  0x48   :  { %1736 = dma.done.wait [#allocation9], 512  }
  0x49   :  { %1737 = vsyncadd [#allocation9], 4294966784  ;;  %v1746_v0 = vmov 0.0|0.0   ;;  %vm1747_vm0 = vmmov 0   ;;  %v1748_v1 = vmov 0.0   ;;  %v101_v2 = vld [vmem:[%s2216_s3] sm:$0xff]  ;;  %v333_v26 = vlaneseq }
  0x4a   :  { %1513 = vmatprep.subr.bf16.mxu1 %v1746_v0  ;;  %1447 = vmatprep.mubr.msk.f32.mxu1 %vm1747_vm0, %v1748_v1  ;;  %v102_v3 = vld [vmem:[%s2216_s3 + $0x8] sm:$0xff]  ;;  %v105_v4 = vld [vmem:[%s2216_s3 + $0x20] sm:$0xff]  ;;  %vm109_vm1 = vcmask 261120   ;;  %v103_v7 = vld [vmem:[%s2216_s3 + $0x10] sm:$0xff]  ;;  %v1749_v24 = vmov 1966171168  }
  0x4b   :  { %v1505_v5 = vpack.c.bf16 %v102_v3, %v101_v2  ;;  %v106_v6 = vld [vmem:[%s2216_s3 + $0x28] sm:$0xff]  ;;  %v104_v8 = vld [vmem:[%s2216_s3 + $0x18] sm:$0xff]  ;;  %v107_v11 = vld [vmem:[%s2216_s3 + $0x30] sm:$0xff]  ;;  %v331_v25 = vunpack.c.l.s4 %v1749_v24  ;;  %v1931_v28 = vshrl.u32 %v333_v26, 7  ;;  %vm524_vm2 = vcmask 1041409   ;;  %s1752_s9 = smov 96  }
  0x4c   :  { %v1514_v9 = vpack.c.bf16 %v106_v6, %v105_v4  ;;  %v1509_v10 = vpack.c.bf16 %v104_v8, %v103_v7  ;;  %v108_v12 = vld [vmem:[%s2216_s3 + $0x38] sm:$0xff]  ;;  %v1884_v13 = vld [vmem:[#allocation5] sm:$0xff]  ;;  %v1889_v15 = vld [vmem:[#allocation2] sm:$0xff]  ;;  %vm526_vm3 = vcmask 1042434   ;;  %vm528_vm4 = vcmask 1043459   ;;  %s1753_s10 = smov 32  }
  0x4d   :  { %1506 = vmatprep.subr.bf16.mxu0 %v1505_v5  ;;  %1427 = vmatprep.mubr.msk.f32.mxu0 %vm109_vm1, %v1884_v13  ;;  %v1517_v14 = vpack.c.bf16 %v108_v12, %v107_v11  ;;  %v1891_v16 = vld [vmem:[#allocation5 + $0x8] sm:$0xff]  ;;  %v1893_v17 = vld [vmem:[#allocation5 + $0x10] sm:$0xff]  ;;  %v1903_v18 = vld [vmem:[#allocation5 + $0x18] sm:$0xff]  ;;  %v332_v27 = vunpack.c.0.s8 %v331_v25  ;;  %v1941_v39 = vsub.s32 0, %v1931_v28  ;;  %vm530_vm5 = vcmask 1044484   ;;  %s1754_s12 = smov [#allocation10]  }
  0x4e   :  { %1515 = vmatpush3.bf16.msra.mxu1 %v1514_v9  ;;  %1508 = vmatpush3.bf16.msra.mxu0 %v1505_v5  ;;  %v1907_v19 = vld [vmem:[#allocation5 + $0x20] sm:$0xff]  ;;  %v1913_v20 = vld [vmem:[#allocation5 + $0x28] sm:$0xff]  ;;  %v1915_v21 = vld [vmem:[#allocation5 + $0x30] sm:$0xff]  ;;  %vm532_vm6 = vcmask 1045509   ;;  %vm534_vm7 = vcmask 1046534   ;;  %vm536_vm8 = vcmask 1047559  }
  0x4f   :  { %1516 = vmatprep.subr.bf16.mxu1 %v1746_v0  ;;  %1510 = vmatprep.subr.bf16.mxu0 %v1509_v10  ;;  %v1921_v22 = vld [vmem:[#allocation5 + $0x38] sm:$0xff]  ;;  %v335_v30 = vsub.s32 %v332_v27, %v1931_v28  ;;  %vm539_vm9 = vcmask 64512   ;;  %vm1333_vm11 = vcmask 523264   ;;  %s1344_s13 = sshll.u32 %s1754_s12, 4  ;;  %vm1335_vm12 = vcmask 588800   ;;  %s1345_s13 = int_to_ptr.vmem [resolvable:$true] %s1344_s13 }
  0x50   :  { %v95_v23 = vld [vmem:[%s2220_s7 + $0x2] sm:$0x1]  ;;  %v1363_v29 = vld [vmem:[%s2220_s7 + $0x1] ss:$0 sm:$0xff]  ;;  %v1365_v38 = vld [vmem:[%s2220_s7] ss:$0 sm:$0xff]  ;;  %p1715_p5 = scmp.lt.s32.totalorder %s1345_s13, %s1345_s13 }
  0x51   :  { %1549 = vpush %v95_v23 }
  0x52   :  { %1518 = vmatpush3.bf16.msra.mxu1 %v1517_v14  ;;  %1512 = vmatpush3.bf16.msra.mxu0 %v1509_v10 }
  0x53   :  { %1519 = vmatprep.subr.bf16.mxu1 %v1746_v0  ;;  %1525 = vmatprep.subr.bf16.mxu0 %v1746_v0 }
  0x55   :  { %1448 = vmatmul.mubr.msk.f32.vlgmr.msra.gmra.mrb[0].mxu1 %vm109_vm1, %v1889_v15  ;;  %1428 = vmatmul.mubr.msk.f32.vlgmr.msra.gmra.mrb[0].mxu0 %vm109_vm1, %v1891_v16 }
  0x56   :  { %1430 = vmatprep.mubr.msk.f32.mxu0 %vm109_vm1, %v1893_v17  ;;  %1458 = vmatprep.mubr.msk.f32.mxu1 %vm1747_vm0, %v1748_v1 }
  0x59   :  { %1431 = vmatmul.mubr.msk.f32.gmra.mrb[2].mxu0 %vm109_vm1, %v1903_v18 }
  0x5a   :  { %1433 = vmatprep.mubr.msk.f32.mxu0 %vm109_vm1, %v1907_v19 }
  0x5d   :  { %1434 = vmatmul.mubr.msk.f32.gmra.mrb[4].mxu0 %vm109_vm1, %v1913_v20 }
  0x5e   :  { %1436 = vmatprep.mubr.msk.f32.mxu0 %vm109_vm1, %v1915_v21 }
  0x61   :  { %1437 = vmatmul.mubr.msk.f32.gmra.mrb[6].mxu0 %vm109_vm1, %v1921_v22 }
  0x62   :  { %1469 = vmatprep.mubr.msk.f32.mxu0 %vm1747_vm0, %v1748_v1 }
  0x82   :  { %s1550_s28 = spop %1549 }
 0x128   :  { %v312_v31 = vpop.f32.mrb[0].mxu1  ;;  %v1429_v32 = vpop.f32.mrb[0].mxu0 }
 0x129   :  { %v313_v33 = vadd.f32 %v1363_v29, %v312_v31  ;;  %v1449_v34 = vpop.f32.mrb[1].mxu1  ;;  %v200_v35 = vpop.f32.mrb[1].mxu0  ;;  %v321_v51 = vadd.f32 %v1429_v32, %v1365_v38 }
 0x12a   :  { %v320_v45 = vadd.f32 %v1365_v38, %v200_v35 }
 0x12b   :  { %v329_v36 = vcombine.high %v313_v33, %v313_v33  ;;  %v336_v37 = vrot.slane %v313_v33, %v335_v30 }
 0x12c   :  { %v1432_v40 = vpop.f32.mrb[2].mxu0 }
 0x12d   :  { %v343_v41 = vrot.slane %v329_v36, %v335_v30  ;;  %v344_v42 = vcombine.high %v336_v37, %v336_v37  ;;  %v352_v43 = vrot.slane %v336_v37, %v335_v30  ;;  %v210_v44 = vpop.f32.mrb[3].mxu0  ;;  %v323_v52 = vadd.f32 %v1432_v40, %v1365_v38 }
 0x12e   :  { %v322_v46 = vadd.f32 %v1365_v38, %v210_v44 }
 0x12f   :  { %v345_v47 = vcombine.high %v343_v41, %v343_v41  ;;  %v366_v48 = vrot.slane %v344_v42, %v335_v30  ;;  %v381_v49 = vrot.slane %v352_v43, %v1941_v39  ;;  %v374_v50 = vcombine.high %v352_v43, %v352_v43 }
 0x130   :  { %v1435_v53 = vpop.f32.mrb[4].mxu0  ;;  %v359_v54 = vrot.slane %v343_v41, %v335_v30 }
 0x131   :  { %v385_v55 = vrot.slane %v366_v48, %v1941_v39  ;;  %v418_v56 = vadd.f32 %v381_v49, %v320_v45  ;;  %v376_v57 = vcombine.high %v366_v48, %v366_v48  ;;  %v389_v58 = vrot.slane %v374_v50, %v1941_v39  ;;  %v220_v59 = vpop.f32.mrb[5].mxu0 }
 0x132   :  { %v325_v60 = vadd.f32 %v1435_v53, %v1365_v38  ;;  %v373_v61 = vrot.slane %v345_v47, %v335_v30  ;;  %v324_v62 = vadd.f32 %v1365_v38, %v220_v59  ;;  %v397_v63 = vrot.slane %v359_v54, %v1941_v39  ;;  %v1366_v30 = vld [vmem:[%s2220_s7 + $0x3] ss:$0 sm:$0xff] }
 0x133   :  { %v419_v2 = vadd.f32 %v385_v55, %v321_v51  ;;  %1568 = vtanh.f32 %v418_v56  ;;  %v393_v3 = vrot.slane %v376_v57, %v1941_v39  ;;  %v420_v4 = vadd.f32 %v389_v58, %v322_v46 }
 0x134   :  { %v401_v5 = vrot.slane %v373_v61, %v1941_v39  ;;  %v422_v6 = vadd.f32 %v397_v63, %v324_v62  ;;  %v1438_v7 = vpop.f32.mrb[6].mxu0  ;;  %v377_v8 = vcombine.high %v373_v61, %v373_v61  ;;  %v375_v9 = vcombine.high %v359_v54, %v359_v54 }
 0x135   :  { %1570 = vtanh.f32 %v419_v2  ;;  %v421_v10 = vadd.f32 %v393_v3, %v323_v52  ;;  %v327_v11 = vadd.f32 %v1438_v7, %v1365_v38  ;;  %v230_v12 = vpop.f32.mrb[7].mxu0  ;;  %v1963_v56 = vand.u32 127, %v333_v26 }
 0x136   :  { %1572 = vtanh.f32 %v420_v4  ;;  %v423_v14 = vadd.f32 %v401_v5, %v325_v60  ;;  %v409_v23 = vrot.slane %v377_v8, %v1941_v39  ;;  %v326_v24 = vadd.f32 %v1365_v38, %v230_v12 }
 0x137   :  { %1574 = vtanh.f32 %v421_v10  ;;  %v405_v25 = vrot.slane %v375_v9, %v1941_v39  ;;  %v472_v57 = vstv %s1550_s28  ;;  %v1967_v59 = vsub.s32 %v1963_v56, %v1931_v28 }
 0x138   :  { %v425_v27 = vadd.f32 %v409_v23, %v327_v11  ;;  %1576 = vtanh.f32 %v422_v6 }
 0x139   :  { %v424_v29 = vadd.f32 %v405_v25, %v326_v24  ;;  %1578 = vtanh.f32 %v423_v14 }
 0x13b   :  { %1580 = vtanh.f32 %v424_v29 }
 0x13c   :  { %1582 = vtanh.f32 %v425_v27 }
 0x13d   :  { %v1569_v31 = vpop.eup %1568 }
 0x13e   :  { %v438_v32 = vmul.f32 %v1569_v31, %v1366_v30 }
 0x13f   :  { %v1571_v33 = vpop.eup %1570 }
 0x140   :  { %v1573_v34 = vpop.eup %1572  ;;  %v446_v35 = vsel %vm109_vm1, %v438_v32, 0.0  ;;  %v439_v36 = vmul.f32 %v1571_v33, %v1366_v30 }
 0x141   :  { %v1575_v37 = vpop.eup %1574  ;;  %447 = vadd.xlane.f32.xlu0 %v446_v35  ;;  %v440_v38 = vmul.f32 %v1573_v34, %v1366_v30 }
 0x142   :  { %v1577_v40 = vpop.eup %1576  ;;  %v441_v42 = vmul.f32 %v1575_v37, %v1366_v30  ;;  %v449_v44 = vsel %vm109_vm1, %v439_v36, 0.0 }
 0x143   :  { %v452_v41 = vsel %vm109_vm1, %v440_v38, 0.0  ;;  %v1579_v43 = vpop.eup %1578  ;;  %v442_v45 = vmul.f32 %v1577_v40, %v1366_v30  ;;  %v1750_v40 = vmov 0  }
 0x144   :  { %453 = vadd.xlane.f32.xlu1 %v452_v41  ;;  %v455_v47 = vsel %vm109_vm1, %v441_v42, 0.0  ;;  %v443_v48 = vmul.f32 %v1579_v43, %v1366_v30  ;;  %1567 = vset.pattern.permute.xlu0 %v1750_v40  ;;  %v550_v41 = vsub.s32 1, %v1931_v28  ;;  %v554_v42 = vsub.s32 2, %v1931_v28 }
 0x145   :  { %v1581_v46 = vpop.eup %1580  ;;  %450 = vadd.xlane.f32.xlu0 %v449_v44  ;;  %v458_v50 = vsel %vm109_vm1, %v442_v45, 0.0  ;;  %1566 = vset.pattern.permute.xlu1 %v1750_v40  ;;  %v558_v43 = vsub.s32 3, %v1931_v28 }
 0x146   :  { %v1583_v49 = vpop.eup %1582  ;;  %v444_v51 = vmul.f32 %v1581_v46, %v1366_v30  ;;  %v461_v52 = vsel %vm109_vm1, %v443_v48, 0.0  ;;  %v562_v48 = vsub.s32 4, %v1931_v28 }
 0x147   :  { %v445_v53 = vmul.f32 %v1583_v49, %v1366_v30 }
 0x148   :  { %456 = vadd.xlane.f32.xlu1 %v455_v47  ;;  %v464_v54 = vsel %vm109_vm1, %v444_v51, 0.0 }
 0x149   :  { %459 = vadd.xlane.f32.xlu0 %v458_v50  ;;  %v467_v55 = vsel %vm109_vm1, %v445_v53, 0.0 }
 0x14c   :  { %462 = vadd.xlane.f32.xlu1 %v461_v52 }
 0x14d   :  { %465 = vadd.xlane.f32.xlu0 %v464_v54 }
 0x150   :  { %468 = vadd.xlane.f32.xlu1 %v467_v55  ;;  %v566_v55 = vsub.s32 5, %v1931_v28 }
 0x1ce   :  { %v448_v58 = vpop.xlane.xlu0 %447 }
 0x1cf   :  { %v474_v60 = vadd.f32 %v472_v57, %v448_v58 }
 0x1d1   :  { %v454_v61 = vpop.xlane.xlu1 %453  ;;  %v495_v3 = vrot.slane %v474_v60, %v1967_v59 }
 0x1d2   :  { %v476_v62 = vadd.f32 %v472_v57, %v454_v61  ;;  %v451_v63 = vpop.xlane.xlu0 %450 }
 0x1d3   :  { %v475_v2 = vadd.f32 %v472_v57, %v451_v63  ;;  %v570_v63 = vsub.s32 6, %v1931_v28 }
 0x1d4   :  { %v503_v26 = vrot.slane %v476_v62, %v1967_v59 }
 0x1d5   :  { %v499_v4 = vrot.slane %v475_v2, %v1967_v59  ;;  %v457_v5 = vpop.xlane.xlu1 %456 }
 0x1d6   :  { %v477_v6 = vadd.f32 %v472_v57, %v457_v5  ;;  %v460_v7 = vpop.xlane.xlu0 %459 }
 0x1d7   :  { %v525_v8 = vsel %vm524_vm2, %v499_v4, %v495_v3  ;;  %v478_v9 = vadd.f32 %v472_v57, %v460_v7 }
 0x1d8   :  { %v527_v10 = vsel %vm526_vm3, %v503_v26, %v525_v8  ;;  %v507_v11 = vrot.slane %v477_v6, %v1967_v59 }
 0x1d9   :  { %v511_v12 = vrot.slane %v478_v9, %v1967_v59  ;;  %v463_v14 = vpop.xlane.xlu1 %462 }
 0x1da   :  { %v529_v23 = vsel %vm528_vm4, %v507_v11, %v527_v10  ;;  %v479_v24 = vadd.f32 %v472_v57, %v463_v14  ;;  %v466_v25 = vpop.xlane.xlu0 %465 }
 0x1db   :  { %v531_v27 = vsel %vm530_vm5, %v511_v12, %v529_v23  ;;  %v480_v29 = vadd.f32 %v472_v57, %v466_v25 }
 0x1dc   :  { %v515_v30 = vrot.slane %v479_v24, %v1967_v59 }
 0x1dd   :  { %v519_v31 = vrot.slane %v480_v29, %v1967_v59  ;;  %v469_v32 = vpop.xlane.xlu1 %468 }
 0x1de   :  { %v481_v33 = vadd.f32 %v472_v57, %v469_v32  ;;  %v533_v34 = vsel %vm532_vm6, %v515_v30, %v531_v27 }
 0x1df   :  { %v535_v35 = vsel %vm534_vm7, %v519_v31, %v533_v34 }
 0x1e0   :  { %v523_v36 = vrot.slane %v481_v33, %v1967_v59 }
 0x1e2   :  { %v537_v37 = vsel %vm536_vm8, %v523_v36, %v535_v35 }
 0x1e3   :  { %v540_v38 = vsel %vm539_vm9, %v537_v37, -inf }
 0x1e4   :  { %541 = vmax.xlane.f32.xlu0 %v540_v38 }
 0x271   :  { %v542_v44 = vpop.xlane.xlu0 %541 }
 0x272   :  { %v547_v45 = vrot.slane %v542_v44, %v1941_v39  ;;  %v551_v46 = vrot.slane %v542_v44, %v550_v41  ;;  %v555_v47 = vrot.slane %v542_v44, %v554_v42  ;;  %v559_v49 = vrot.slane %v542_v44, %v558_v43 }
 0x273   :  { %v563_v57 = vrot.slane %v542_v44, %v562_v48  ;;  %v567_v3 = vrot.slane %v542_v44, %v566_v55 }
 0x274   :  { %v584_v50 = vsub.f32 %v474_v60, %v547_v45  ;;  %v585_v51 = vsub.f32 %v475_v2, %v551_v46  ;;  %v586_v52 = vsub.f32 %v476_v62, %v555_v47  ;;  %v587_v58 = vsub.f32 %v477_v6, %v559_v49 }
 0x275   :  { %v588_v4 = vsub.f32 %v478_v9, %v563_v57  ;;  %v574_v62 = vsub.s32 7, %v1931_v28  ;;  %v571_v2 = vrot.slane %v542_v44, %v570_v63  ;;  %v589_v5 = vsub.f32 %v479_v24, %v567_v3 }
 0x276   :  { %v592_v53 = vmul.f32 1.442695, %v584_v50  ;;  %v594_v54 = vmul.f32 1.442695, %v585_v51  ;;  %v596_v61 = vmul.f32 1.442695, %v586_v52 }
 0x277   :  { %v598_v60 = vmul.f32 1.442695, %v587_v58  ;;  %v600_v26 = vmul.f32 1.442695, %v588_v4  ;;  %v575_v8 = vrot.slane %v542_v44, %v574_v62  ;;  %v590_v9 = vsub.f32 %v480_v29, %v571_v2  ;;  %v849_v2 = vld [vmem:[%s2217_s4 + $0x28] sm:$0xff] }
 0x278   :  { %1584 = vpow2.f32 %v592_v53  ;;  %v602_v10 = vmul.f32 1.442695, %v589_v5  ;;  %v850_v5 = vld [vmem:[%s2217_s4 + $0x30] sm:$0xff] }
 0x279   :  { %1586 = vpow2.f32 %v594_v54  ;;  %v591_v12 = vsub.f32 %v481_v33, %v575_v8  ;;  %v604_v14 = vmul.f32 1.442695, %v590_v9  ;;  %v852_v9 = vld [vmem:[%s2217_s4 + $0x40] sm:$0xff] }
 0x27a   :  { %1588 = vpow2.f32 %v596_v61 }
 0x27b   :  { %1590 = vpow2.f32 %v598_v60  ;;  %v606_v24 = vmul.f32 1.442695, %v591_v12  ;;  %v848_v60 = vld [vmem:[%s2217_s4 + $0x20] sm:$0xff] }
 0x27c   :  { %1592 = vpow2.f32 %v600_v26  ;;  %v851_v26 = vld [vmem:[%s2217_s4 + $0x38] sm:$0xff]  ;;  %v83_v12 = vld [vmem:[%s2213_s0] sm:$0xff] }
 0x27d   :  { %1594 = vpow2.f32 %v602_v10  ;;  %v1523_v8 = vpack.c.bf16 %v851_v26, %v850_v5  ;;  %v853_v10 = vld [vmem:[%s2217_s4 + $0x48] sm:$0xff] }
 0x27e   :  { %1596 = vpow2.f32 %v604_v14  ;;  %v1532_v14 = vpack.c.bf16 %v853_v10, %v852_v9 }
 0x27f   :  { %1598 = vpow2.f32 %v606_v24  ;;  %v854_v24 = vld [vmem:[%s2217_s4 + $0x50] sm:$0xff] }
 0x282   :  { %v2005_v6 = vpop.eup %1584 }
 0x283   :  { %v2007_v7 = vpop.eup %1586  ;;  %617 = vperm.xlu1 %1566, %v2005_v6  }
 0x284   :  { %620 = vperm.xlu0 %1567, %v2007_v7   ;;  %v2013_v11 = vpop.eup %1588 }
 0x285   :  { %v2016_v23 = vpop.eup %1590 }
 0x286   :  { %v2019_v25 = vpop.eup %1592 }
 0x287   :  { %623 = vperm.xlu1 %1566, %v2013_v11   ;;  %v2022_v27 = vpop.eup %1594 }
 0x288   :  { %v2025_v29 = vpop.eup %1596 }
 0x289   :  { %v2028_v30 = vpop.eup %1598 }
 0x28b   :  { %626 = vperm.xlu1 %1566, %v2016_v23  }
 0x28f   :  { %629 = vperm.xlu1 %1566, %v2019_v25  }
 0x293   :  { %632 = vperm.xlu1 %1566, %v2022_v27  }
 0x297   :  { %635 = vperm.xlu1 %1566, %v2025_v29  }
 0x29b   :  { %638 = vperm.xlu1 %1566, %v2028_v30  }
 0x302   :  { %v618_v31 = vpop.permute.xlu1 %617 }
 0x303   :  { %v621_v35 = vpop.permute.xlu0 %620  ;;  %v643_v38 = vrot.slane %v618_v31, %v1967_v59  ;;  %v855_v31 = vld [vmem:[%s2217_s4 + $0x58] sm:$0xff] }
 0x304   :  { %v647_v37 = vrot.slane %v621_v35, %v1967_v59 }
 0x306   :  { %v624_v32 = vpop.permute.xlu1 %623  ;;  %v672_v47 = vsel %vm524_vm2, %v647_v37, %v643_v38 }
 0x307   :  { %v651_v40 = vrot.slane %v624_v32, %v1967_v59  ;;  %v1535_v32 = vpack.c.bf16 %v855_v31, %v854_v24 }
 0x309   :  { %v673_v50 = vsel %vm526_vm3, %v651_v40, %v672_v47 }
 0x30a   :  { %v627_v33 = vpop.permute.xlu1 %626 }
 0x30b   :  { %v655_v44 = vrot.slane %v627_v33, %v1967_v59 }
 0x30d   :  { %v674_v52 = vsel %vm528_vm4, %v655_v44, %v673_v50 }
 0x30e   :  { %v630_v34 = vpop.permute.xlu1 %629 }
 0x30f   :  { %v659_v45 = vrot.slane %v630_v34, %v1967_v59 }
 0x311   :  { %v675_v53 = vsel %vm530_vm5, %v659_v45, %v674_v52 }
 0x312   :  { %v633_v36 = vpop.permute.xlu1 %632 }
 0x313   :  { %v663_v49 = vrot.slane %v633_v36, %v1967_v59 }
 0x315   :  { %v676_v57 = vsel %vm532_vm6, %v663_v49, %v675_v53 }
 0x316   :  { %v636_v46 = vpop.permute.xlu1 %635 }
 0x317   :  { %v667_v51 = vrot.slane %v636_v46, %v1967_v59 }
 0x319   :  { %v677_v61 = vsel %vm534_vm7, %v667_v51, %v676_v57  ;;  %v1291_v57 = vadd.s32 4294967232, %v1963_v56 }
 0x31a   :  { %v639_v54 = vpop.permute.xlu1 %638 }
 0x31b   :  { %v671_v58 = vrot.slane %v639_v54, %v1967_v59  ;;  %v1520_v59 = vpack.c.bf16 %v849_v2, %v848_v60 }
 0x31d   :  { %v678_v3 = vsel %vm536_vm8, %v671_v58, %v677_v61  ;;  %1521 = vmatpush3.bf16.msra.mxu1 %v1520_v59  ;;  %v1370_v61 = vld [vmem:[%s2220_s7 + $0x5] ss:$0 sm:$0xff] }
 0x31e   :  { %v680_v4 = vsel %vm539_vm9, %v678_v3, 0.0  ;;  %1522 = vmatprep.subr.bf16.mxu1 %v1746_v0  ;;  %v2129_v3 = vsub.s32 %v1291_v57, %v1931_v28 }
 0x31f   :  { %681 = vadd.xlane.f32.xlu1 %v680_v4 }
 0x321   :  { %1524 = vmatpush3.bf16.msra.mxu1 %v1523_v8 }
 0x322   :  { %1531 = vmatprep.subr.bf16.mxu1 %v1746_v0 }
 0x324   :  { %1459 = vmatmul.mubr.msk.f32.vlgmr.msra.gmra.mrb[2].mxu1 %vm109_vm1, %v83_v12 }
 0x325   :  { %1533 = vmatpush3.bf16.msra.mxu1 %v1532_v14  ;;  %1480 = vmatprep.mubr.msk.f32.mxu1 %vm1747_vm0, %v1748_v1 }
 0x326   :  { %1534 = vmatprep.subr.bf16.mxu1 %v1746_v0 }
 0x329   :  { %1536 = vmatpush3.bf16.msra.mxu1 %v1535_v32 }
 0x32a   :  { %1543 = vmatprep.subr.bf16.mxu1 %v1746_v0 }
 0x32c   :  { %1481 = vmatmul.mubr.msk.f32.vlgmr.msra.gmra.mrb[4].mxu1 %vm109_vm1, %v1889_v15 }
 0x32d   :  { %1502 = vmatprep.mubr.msk.f32.mxu1 %vm1747_vm0, %v1748_v1 }
 0x3ac   :  { %v682_v33 = vpop.xlane.xlu1 %681 }
 0x3ad   :  { %v687_v34 = vrot.slane %v682_v33, %v1941_v39  ;;  %v691_v35 = vrot.slane %v682_v33, %v550_v41  ;;  %v695_v36 = vrot.slane %v682_v33, %v554_v42  ;;  %v699_v37 = vrot.slane %v682_v33, %v558_v43 }
 0x3ae   :  { %v703_v40 = vrot.slane %v682_v33, %v562_v48  ;;  %v707_v41 = vrot.slane %v682_v33, %v566_v55  ;;  %v711_v43 = vrot.slane %v682_v33, %v570_v63  ;;  %v715_v48 = vrot.slane %v682_v33, %v574_v62  ;;  %v844_v62 = vld [vmem:[%s2217_s4] sm:$0xff] }
 0x3af   :  { %1600 = vrcp.f32 %v687_v34 }
 0x3b0   :  { %1602 = vrcp.f32 %v691_v35 }
 0x3b1   :  { %1604 = vrcp.f32 %v695_v36 }
 0x3b2   :  { %1606 = vrcp.f32 %v699_v37 }
 0x3b3   :  { %1608 = vrcp.f32 %v703_v40 }
 0x3b4   :  { %1610 = vrcp.f32 %v707_v41 }
 0x3b5   :  { %1612 = vrcp.f32 %v711_v43 }
 0x3b6   :  { %1614 = vrcp.f32 %v715_v48 }
 0x3b9   :  { %v1601_v38 = vpop.eup %1600 }
 0x3ba   :  { %v725_v44 = vmul.f32 %v1601_v38, %v2005_v6  ;;  %v1603_v39 = vpop.eup %1602 }
 0x3bb   :  { %v727_v45 = vmul.f32 %v1603_v39, %v2007_v7  ;;  %v1605_v42 = vpop.eup %1604 }
 0x3bc   :  { %742 = vperm.xlu0 %1567, %v725_v44   ;;  %v729_v46 = vmul.f32 %v1605_v42, %v2013_v11  ;;  %v1607_v47 = vpop.eup %1606 }
 0x3bd   :  { %v731_v6 = vmul.f32 %v1607_v47, %v2016_v23  ;;  %v1609_v49 = vpop.eup %1608  ;;  %v845_v23 = vld [vmem:[%s2217_s4 + $0x8] sm:$0xff] }
 0x3be   :  { %v733_v55 = vmul.f32 %v1609_v49, %v2019_v25  ;;  %v1611_v7 = vpop.eup %1610  ;;  %v846_v25 = vld [vmem:[%s2217_s4 + $0x10] sm:$0xff] }
 0x3bf   :  { %v735_v50 = vmul.f32 %v1611_v7, %v2022_v27  ;;  %v1613_v63 = vpop.eup %1612  ;;  %v1526_v27 = vpack.c.bf16 %v845_v23, %v844_v62 }
 0x3c0   :  { %747 = vperm.xlu0 %1567, %v727_v45   ;;  %v737_v11 = vmul.f32 %v1613_v63, %v2025_v29  ;;  %v1615_v51 = vpop.eup %1614  ;;  %v847_v29 = vld [vmem:[%s2217_s4 + $0x18] sm:$0xff]  ;;  %s1751_s4 = smov 64  }
 0x3c1   :  { %v739_v52 = vmul.f32 %v1615_v51, %v2028_v30  ;;  %1527 = vmatpush3.bf16.msra.mxu0 %v1526_v27  ;;  %v1529_v30 = vpack.c.bf16 %v847_v29, %v846_v25 }
 0x3c2   :  { %1528 = vmatprep.subr.bf16.mxu0 %v1746_v0 }
 0x3c4   :  { %752 = vperm.xlu0 %1567, %v729_v46  }
 0x3c5   :  { %1530 = vmatpush3.bf16.msra.mxu0 %v1529_v30 }
 0x3c6   :  { %1537 = vmatprep.subr.bf16.mxu0 %v1746_v0 }
 0x3c8   :  { %757 = vperm.xlu0 %1567, %v731_v6  }
 0x3cc   :  { %762 = vperm.xlu0 %1567, %v733_v55  }
 0x3d0   :  { %767 = vperm.xlu0 %1567, %v735_v50  }
 0x3d4   :  { %772 = vperm.xlu0 %1567, %v737_v11  }
 0x3d8   :  { %777 = vperm.xlu0 %1567, %v739_v52  }
 0x3f7   :  { %v2122_v53 = vpop.f32.mrb[2].mxu1 }
 0x3f8   :  { %v1460_v54 = vpop.f32.mrb[3].mxu1 }
 0x3ff   :  { %v1091_v4 = vpop.f32.mrb[4].mxu1 }
 0x400   :  { %v2131_v60 = vadd.f32 %v1370_v61, %v1091_v4  ;;  %v1482_v2 = vpop.f32.mrb[5].mxu1 }
 0x402   :  { %1103 = vrot.lane.b32.xlu1 %v2131_v60, %s1751_s4 }
 0x43b   :  { %v743_v58 = vpop.permute.xlu0 %742 }
 0x43c   :  { %v1295_v59 = vrot.slane %v743_v58, %v2129_v3  ;;  %v780_v28 = vmul.f32 %v743_v58, %v1884_v13 }
 0x43e   :  { %v788_v33 = vsel %vm109_vm1, %v780_v28, 0.0 }
 0x43f   :  { %v748_v5 = vpop.permute.xlu0 %747  ;;  %v789_v37 = vrot.slane %v788_v33, 4 }
 0x440   :  { %v1299_v26 = vrot.slane %v748_v5, %v2129_v3  ;;  %v781_v56 = vmul.f32 %v748_v5, %v1891_v16 }
 0x441   :  { %v790_v43 = vadd.f32 %v789_v37, %v788_v33 }
 0x442   :  { %v1324_v8 = vsel %vm524_vm2, %v1299_v26, %v1295_v59  ;;  %v795_v14 = vsel %vm109_vm1, %v781_v56, 0.0 }
 0x443   :  { %v753_v9 = vpop.permute.xlu0 %752  ;;  %v796_v35 = vrot.slane %v795_v14, 4  ;;  %v791_v11 = vrot.slane %v790_v43, 2 }
 0x444   :  { %v782_v10 = vmul.f32 %v753_v9, %v1893_v17  ;;  %v1303_v12 = vrot.slane %v753_v9, %v2129_v3 }
 0x445   :  { %v797_v41 = vadd.f32 %v796_v35, %v795_v14  ;;  %v792_v58 = vadd.f32 %v791_v11, %v790_v43 }
 0x446   :  { %v1325_v24 = vsel %vm526_vm3, %v1303_v12, %v1324_v8  ;;  %v802_v31 = vsel %vm109_vm1, %v782_v10, 0.0 }
 0x447   :  { %v758_v32 = vpop.permute.xlu0 %757  ;;  %v803_v36 = vrot.slane %v802_v31, 4  ;;  %v798_v55 = vrot.slane %v797_v41, 2  ;;  %v793_v10 = vrot.slane %v792_v58, 1 }
 0x448   :  { %v783_v16 = vmul.f32 %v758_v32, %v1903_v18  ;;  %v1307_v34 = vrot.slane %v758_v32, %v2129_v3 }
 0x449   :  { %v804_v45 = vadd.f32 %v803_v36, %v802_v31  ;;  %v799_v29 = vadd.f32 %v798_v55, %v797_v41  ;;  %v794_v36 = vadd.f32 %v793_v10, %v792_v58  ;;  %v1210_v58 = vld [vmem:[#allocation8] sm:$0xff]  ;;  %v1213_v10 = vld [vmem:[#allocation8 + $0x18] sm:$0xff] }
 0x44a   :  { %v809_v13 = vsel %vm109_vm1, %v783_v16, 0.0  ;;  %v1326_v17 = vsel %vm528_vm4, %v1307_v34, %v1325_v24 }
 0x44b   :  { %v810_v38 = vrot.slane %v809_v13, 4  ;;  %v763_v40 = vpop.permute.xlu0 %762  ;;  %v805_v50 = vrot.slane %v804_v45, 2  ;;  %v800_v26 = vrot.slane %v799_v29, 1 }
 0x44c   :  { %v784_v44 = vmul.f32 %v763_v40, %v1907_v19  ;;  %v1311_v39 = vrot.slane %v763_v40, %v2129_v3 }
 0x44d   :  { %v811_v46 = vadd.f32 %v810_v38, %v809_v13  ;;  %v806_v30 = vadd.f32 %v805_v50, %v804_v45  ;;  %v801_v32 = vadd.f32 %v800_v26, %v799_v29  ;;  %v1125_v29 = vld [vmem:[#allocation7 + $0x8] sm:$0xff] }
 0x44e   :  { %v816_v42 = vsel %vm109_vm1, %v784_v44, 0.0  ;;  %v1327_v18 = vsel %vm530_vm5, %v1311_v39, %v1326_v17 }
 0x44f   :  { %v817_v47 = vrot.slane %v816_v42, 4  ;;  %v768_v48 = vpop.permute.xlu0 %767  ;;  %v812_v51 = vrot.slane %v811_v46, 2  ;;  %v807_v9 = vrot.slane %v806_v30, 1  ;;  %v937_v38 = vsel %vm524_vm2, %v801_v32, %v794_v36 }
 0x450   :  { %v785_v6 = vmul.f32 %v768_v48, %v1913_v20  ;;  %v1315_v49 = vrot.slane %v768_v48, %v2129_v3 }
 0x451   :  { %v818_v7 = vadd.f32 %v817_v47, %v816_v42  ;;  %v813_v61 = vadd.f32 %v812_v51, %v811_v46  ;;  %v808_v35 = vadd.f32 %v807_v9, %v806_v30  ;;  %v1127_v30 = vld [vmem:[#allocation7 + $0x18] sm:$0xff] }
 0x452   :  { %v823_v19 = vsel %vm109_vm1, %v785_v6, 0.0  ;;  %v1328_v63 = vsel %vm532_vm6, %v1315_v49, %v1327_v18  ;;  %v1369_v6 = vld [vmem:[%s2220_s7 + $0x4] ss:$0 sm:$0xff] }
 0x453   :  { %v824_v52 = vrot.slane %v823_v19, 4  ;;  %v773_v62 = vpop.permute.xlu0 %772  ;;  %v819_v23 = vrot.slane %v818_v7, 2  ;;  %v814_v12 = vrot.slane %v813_v61, 1  ;;  %v938_v39 = vsel %vm526_vm3, %v808_v35, %v937_v38 }
 0x454   :  { %v786_v25 = vmul.f32 %v773_v62, %v1915_v21  ;;  %v1319_v27 = vrot.slane %v773_v62, %v2129_v3 }
 0x455   :  { %v825_v20 = vadd.f32 %v824_v52, %v823_v19  ;;  %v820_v59 = vadd.f32 %v819_v23, %v818_v7  ;;  %v815_v13 = vadd.f32 %v814_v12, %v813_v61  ;;  %v1211_v61 = vld [vmem:[#allocation8 + $0x8] sm:$0xff] }
 0x456   :  { %v830_v54 = vsel %vm109_vm1, %v786_v25, 0.0  ;;  %v2162_v57 = vsel %vm534_vm7, %v1319_v27, %v1328_v63  ;;  %v1124_v27 = vld [vmem:[#allocation7] sm:$0xff] }
 0x457   :  { %v826_v4 = vrot.slane %v825_v20, 2  ;;  %v831_v2 = vrot.slane %v830_v54, 4  ;;  %v2164_v5 = vpop.permute.xlu0 %777  ;;  %v821_v31 = vrot.slane %v820_v59, 1  ;;  %v939_v45 = vsel %vm528_vm4, %v815_v13, %v938_v39 }
 0x458   :  { %v787_v21 = vmul.f32 %v2164_v5, %v1921_v22 }
 0x459   :  { %v827_v56 = vadd.f32 %v826_v4, %v825_v20  ;;  %v832_v8 = vadd.f32 %v831_v2, %v830_v54  ;;  %v822_v37 = vadd.f32 %v821_v31, %v820_v59  ;;  %v1538_v20 = vpack.c.bf16 %v1125_v29, %v1124_v27 }
 0x45a   :  { %v837_v28 = vsel %vm109_vm1, %v787_v21, 0.0  ;;  %v1544_v4 = vpack.c.bf16 %v1211_v61, %v1210_v58 }
 0x45b   :  { %v833_v14 = vrot.slane %v832_v8, 2  ;;  %v838_v24 = vrot.slane %v837_v28, 4  ;;  %v828_v33 = vrot.slane %v827_v56, 1  ;;  %v940_v18 = vsel %vm530_vm5, %v822_v37, %v939_v45 }
 0x45c   :  { %1545 = vmatpush3.bf16.msra.mxu1 %v1544_v4 }
 0x45d   :  { %v834_v16 = vadd.f32 %v833_v14, %v832_v8  ;;  %v839_v34 = vadd.f32 %v838_v24, %v837_v28  ;;  %v829_v40 = vadd.f32 %v828_v33, %v827_v56  ;;  %1546 = vmatprep.subr.bf16.mxu1 %v1746_v0  ;;  %v1212_v28 = vld [vmem:[#allocation8 + $0x10] sm:$0xff]  ;;  %v1375_v33 = vld [vmem:[%s2220_s7 + $0x7] ss:$0 sm:$0xff] }
 0x45e   :  { %v1547_v12 = vpack.c.bf16 %v1213_v10, %v1212_v28 }
 0x45f   :  { %v835_v17 = vrot.slane %v834_v16, 1  ;;  %v840_v22 = vrot.slane %v839_v34, 2  ;;  %v941_v46 = vsel %vm532_vm6, %v829_v40, %v940_v18 }
 0x460   :  { %1548 = vmatpush3.bf16.msra.mxu1 %v1547_v12 }
 0x461   :  { %v841_v44 = vadd.f32 %v840_v22, %v839_v34  ;;  %v836_v41 = vadd.f32 %v835_v17, %v834_v16  ;;  %v1323_v16 = vrot.slane %v2164_v5, %v2129_v3 }
 0x463   :  { %v842_v42 = vrot.slane %v841_v44, 1  ;;  %v942_v47 = vsel %vm534_vm7, %v836_v41, %v941_v46  ;;  %v1330_v17 = vsel %vm536_vm8, %v1323_v16, %v2162_v57 }
 0x465   :  { %v843_v43 = vadd.f32 %v842_v42, %v841_v44 }
 0x467   :  { %v943_v48 = vsel %vm536_vm8, %v843_v43, %v942_v47 }
 0x468   :  { %1470 = vmatmul.mubr.msk.f32.vlgmr.msra.gmra.mrb[8].mxu0 %vm109_vm1, %v943_v48 }
 0x469   :  { %1491 = vmatprep.mubr.msk.f32.mxu0 %vm1747_vm0, %v1748_v1  ;;  %1539 = vmatpush3.bf16.msra.mxu0 %v1538_v20 }
 0x46a   :  { %1540 = vmatprep.subr.bf16.mxu0 %v1746_v0 }
 0x474   :  { %v1104_v52 = vpop.permute.xlu1 %1103 }
 0x53b   :  { %v1012_v49 = vpop.f32.mrb[8].mxu0 }
 0x53c   :  { %v1013_v55 = vadd.f32 %v1012_v49, %v2122_v53  ;;  %v1471_v7 = vpop.f32.mrb[9].mxu0  ;;  %v1126_v53 = vld [vmem:[#allocation7 + $0x10] sm:$0xff] }
 0x53e   :  { %v1020_v50 = vadd.f32 %v1369_v6, %v1013_v55 }
 0x540   :  { %v1095_v19 = vadd.f32 %v2131_v60, %v1020_v50  ;;  %v1541_v60 = vpack.c.bf16 %v1127_v30, %v1126_v53 }
 0x542   :  { %v1372_v63 = vmul.f32 -1.442695, %v1095_v19  ;;  %1542 = vmatpush3.bf16.msra.mxu0 %v1541_v60 }
 0x544   :  { %1616 = vpow2.f32 %v1372_v63 }
 0x54e   :  { %v1617_v11 = vpop.eup %1616 }
 0x54f   :  { %v1099_v51 = vadd.f32 1.0, %v1617_v11 }
 0x551   :  { %1618 = vrcp.f32 %v1099_v51 }
 0x55b   :  { %v1619_v62 = vpop.eup %1618 }
 0x55c   :  { %v1106_v23 = vmul.f32 %v1619_v62, %v1104_v52  ;;  %v1113_v59 = vsub.f32 1.0, %v1619_v62 }
 0x55e   :  { %1108 = vrot.lane.b32.xlu0 %v1106_v23, %s1751_s4 }
 0x5d0   :  { %v1109_v1 = vpop.permute.xlu0 %1108 }
 0x5d1   :  { %v1111_v25 = vadd.f32 %v1109_v1, %v1020_v50 }
 0x5d3   :  { %1620 = vtanh.f32 %v1111_v25 }
 0x5dd   :  { %v1621_v54 = vpop.eup %1620 }
 0x5de   :  { %1115 = vrot.lane.b32.xlu0 %v1621_v54, %s1752_s9 }
 0x5e2   :  { %1119 = vrot.lane.b32.xlu0 %v1889_v15, %s1753_s10  ;;  %v1373_v15 = vld [vmem:[%s2220_s7 + $0x6] ss:$0 sm:$0xff]  ;;  %s1710_s7 = scalar_lea.vmem %s1345_s13, 128 }
 0x5e3   :  { %p1711_p4 = scmp.ne.s32.totalorder %s1345_s13, %s1710_s7  ;;  %p1716_p6 = scmp.lt.s32.totalorder %s1710_s7, %s1710_s7 }
 0x5e5   :  { %p1717_p7 = por %p1716_p6, %p1715_p5 }
 0x5e7   :  { %p1718_p8 = pnand %p1717_p7, %p1711_p4 }
 0x650   :  { %v1116_v2 = vpop.permute.xlu0 %1115 }
 0x651   :  { %v1118_v26 = vmul.f32 %v1116_v2, %v1113_v59 }
 0x654   :  { %v1120_v21 = vpop.permute.xlu0 %1119 }
 0x655   :  { %v1122_v56 = vmul.f32 %v1619_v62, %v1120_v21 }
 0x657   :  { %v1123_v8 = vadd.f32 %v1122_v56, %v1118_v26 }
 0x659   :  { %1133 = vrot.lane.b32.xlu0 %v1123_v8, %s1752_s9 }
 0x6cb   :  { %v1134_v9 = vpop.permute.xlu0 %1133 }
 0x6cc   :  { %1492 = vmatmul.mubr.msk.f32.vlgmr.msra.gmra.mrb[10].mxu0 %vm109_vm1, %v1134_v9 }
 0x79f   :  { %v1203_v14 = vpop.f32.mrb[10].mxu0 }
 0x7a0   :  { %v1204_v24 = vadd.f32 %v1373_v15, %v1203_v14  ;;  %v1493_v0 = vpop.f32.mrb[11].mxu0 }
 0x7a2   :  { %vm1207_vm10 = vcmp.ge.f32.partialorder %v1204_v24, 0.0  ;;  %v1208_v31 = vmul.f32 0.01, %v1204_v24 }
 0x7a4   :  { %v1209_v32 = vsel %vm1207_vm10, %v1204_v24, %v1208_v31 }
 0x7a5   :  { %1503 = vmatmul.mubr.msk.f32.vlgmr.msra.gmra.mrb[6].mxu1 %vm109_vm1, %v1209_v32 }
 0x878   :  { %v1287_v34 = vpop.f32.mrb[6].mxu1 }
 0x879   :  { %v1288_v35 = vadd.f32 %v1375_v33, %v1287_v34  ;;  %v1504_v36 = vpop.f32.mrb[7].mxu1 }
 0x87b   :  { %v1332_v13 = vsel %vm109_vm1, %v1288_v35, %v1123_v8 }
 0x87c   :  { %v1334_v22 = vsel %vm1333_vm11, %v1332_v13, %v1330_v17 }
 0x87d   :  { %v1336_v37 = vsel %vm1335_vm12, %v1334_v22, 0.0 }
 0x87e   :  { %1337 = vst [vmem:[#allocation10] sm:$0xff] %v1336_v37 }
 0x87f   :  { %1721 = shalt.err (!%p1718_p8)
}
 0x880   :  { %s1722_s18 = scalar_lea.hbm %s2221_s8, 128 }
 0x881   :  { %p1723_p9 = scmp.ne.s32.totalorder %s2221_s8, %s1722_s18  ;;  %p1726_p10 = scmp.lt.u32.totalorder %s1722_s18, %s2221_s8 }
 0x883   :  { %p1728_p11 = pnand %p1726_p10, %p1723_p9 }
 0x885   :  { %1731 = shalt.err (!%p1728_p11)
}
 0x886   :  { %1347 = dma.vmem_to_hbm [thread:$0]  %s1345_s13, 128, %s2221_s8, [#allocation4]  }
 0x887   :  { %1738 = dma.done.wait [#allocation4], 128  }
 0x888   :  { %1739 = vsyncadd [#allocation4], 4294967168 }
 0x889   :  { %1351 = vsyncpa [#allocation3], 1 }
 0x88a   :  { %1352 = vsyncpa [#allocation6], 1 }
 0x88b   :  { %1353 = vsyncpa [#allocation9], 1 }
 0x88c   :  { %1354 = vsyncpa [#allocation4], 1 }

</bundles_post_ra>
